<compile_context>
chip_gen: v5e
topology: v5e:2x2
jax: 0.10.0
libtpu: 0.0.40
codegen_flags: <defaults>
</compile_context>

<pallas_src>
import numpy as np
import jax
import jax.numpy as jnp
from jax.experimental import pallas as pl
from jax.experimental.pallas import tpu as pltpu

# ---------------- model hyper-parameters (small, consistent with the module) ----------------
B = 2                      # batch (n_trials)
C = 4                      # in_chans (EEG electrodes)
T = 32                     # input_window_samples (n_samples)
FS = 16                    # sampling rate -> coherence window length / stride
BANDS = [(1.0, 4.0), (4.0, 7.0)]   # filterRange
FB = len(BANDS)            # n_filterbank
FT = 8                     # n_filters_time
KT = 5                     # filter_time_length
F = 8                      # n_filters_spat == n_filters_power == n_filters_coherence
NCLS = 3                   # n_classes
POOL_LEN = 8               # pool_time_length
POOL_STR = 4               # pool_time_stride
FC_LEN = 4                 # final_conv_length
FC_STR = 2                 # final_conv_stride
PAD = (KT - 1) // 2        # get_padding((KT, 1))
TP = T + 2 * PAD
T_POOL = (T - POOL_LEN) // POOL_STR + 1
T_CLS = (T_POOL - FC_LEN) // FC_STR + 1
WIN_LEN = FS               # coherence_cropped(time_length=fs, time_stride=fs)
WIN_STR = FS
N_WIN = (T - WIN_LEN) // WIN_STR + 1
HOUT = T_CLS + N_WIN
BN_EPS = 1e-5
SAFE_LOG_EPS = 1e-6
M = KT * FB * C            # folded contraction length for the time+spatial conv


def _r8(v):
    return ((v + 7) // 8) * 8


# layout of the single packed constant-parameter slab (rows are 8-aligned per section)
ROW_FILT = 0                       # (T, FB*TP)   merged IIR impulse-response matrices
ROW_W = _r8(ROW_FILT + T)          # (2F, M+1)    folded conv weights, last col = folded bias
ROW_POOL = _r8(ROW_W + 2 * F)      # (T, T_POOL)  AvgPool matrix
ROW_BIAS = _r8(ROW_POOL + T)       # (NCLS, HOUT) classifier bias per output column
P_ROWS = _r8(ROW_BIAS + NCLS)
P_LANES = 128
assert max(FB * TP, M + 1, T_POOL, HOUT) <= P_LANES


# ---------------------------------- fused Pallas kernel ----------------------------------
def fused_kernel(x_ref, params_ref, wcls_ref, o_ref):
    # x_ref: (B, C, T)   params_ref: (P_ROWS, 128)   wcls_ref: (NCLS, F, FC_LEN+F)
    # o_ref: (B*NCLS, HOUT)
    filt = params_ref[ROW_FILT:ROW_FILT + T, 0:FB * TP]          # (T, FB*TP)
    w_aug = params_ref[ROW_W:ROW_W + 2 * F, 0:M + 1]             # (2F, M+1)
    pool = params_ref[ROW_POOL:ROW_POOL + T, 0:T_POOL]           # (T, T_POOL)
    bias = params_ref[ROW_BIAS:ROW_BIAS + NCLS, 0:HOUT]          # (NCLS, HOUT)
    wcp = wcls_ref[:, :, 0:FC_LEN]                               # (NCLS, F, FC_LEN)
    wcc = wcls_ref[:, :, FC_LEN:FC_LEN + F]                      # (NCLS, F, F)
    ones_row = jnp.ones((1, T), jnp.float32)

    outs = []
    for b in range(x_ref.shape[0]):                              # static unroll over batch
        x = x_ref[b]                                             # (C, T)

        # --- filterbank: all bands in ONE impulse-response matmul; clamp matches
        #     torchaudio.lfilter(clamp=True).  Columns already zero-padded for conv_time.
        xw = jnp.clip(jnp.dot(x, filt, preferred_element_type=jnp.float32), -1.0, 1.0)
        xf = jnp.concatenate([xw[:, band * TP:(band + 1) * TP] for band in range(FB)],
                             axis=0)                             # (FB*C, TP)

        # --- conv_time + conv_spat_{power,conne} + BatchNorm + bias, ONE dot for BOTH
        #     branches: shifted slab + ones row (bias) against the (2F, M+1) folded weight.
        slab = jnp.concatenate([xf[:, k:k + T] for k in range(KT)] + [ones_row],
                               axis=0)                           # (M+1, T)
        z = jnp.dot(w_aug, slab, preferred_element_type=jnp.float32)   # (2F, T)
        z_p = z[0:F, :]
        z_c = z[F:2 * F, :]

        # --- power branch: square -> AvgPool (matmul) -> safe_log -> strided classifier conv
        pooled = jnp.dot(z_p * z_p, pool, preferred_element_type=jnp.float32)  # (F, T_POOL)
        logp = jnp.log(jnp.maximum(pooled, SAFE_LOG_EPS))                       # safe_log
        pcols = []
        for t in range(T_CLS):
            win = logp[:, t * FC_STR: t * FC_STR + FC_LEN]       # (F, FC_LEN)
            pcols.append(jnp.sum(jnp.sum(wcp * win[None, :, :], axis=-1),
                                 axis=-1, keepdims=True))        # (NCLS, 1)

        # --- coherence branch: windowed corrcoef -> (F,F) classifier conv
        ccols = []
        for w in range(N_WIN):
            seg = z_c[:, w * WIN_STR: w * WIN_STR + WIN_LEN]     # (F, WIN_LEN)
            segc = seg - jnp.mean(seg, axis=1, keepdims=True)
            var = jnp.sum(segc * segc, axis=1, keepdims=True)    # (F, 1)
            u = segc * jax.lax.rsqrt(var + 1e-12)                # eps guards var == 0
            corr = jnp.dot(u, u.T, preferred_element_type=jnp.float32)   # (F, F)
            corr = jnp.clip(corr, -1.0, 1.0)                     # torch.corrcoef clips
            ccols.append(jnp.sum(jnp.sum(wcc * corr[None, :, :], axis=-1),
                                 axis=-1, keepdims=True))        # (NCLS, 1)

        # --- torch.cat(dim=2) + bias (added once) + LogSoftmax(dim=1) + squeeze
        xo = jnp.concatenate(pcols + ccols, axis=1) + bias       # (NCLS, HOUT)
        mx = jnp.max(xo, axis=0, keepdims=True)
        lse = mx + jnp.log(jnp.sum(jnp.exp(xo - mx), axis=0, keepdims=True))
        outs.append(xo - lse)

    o_ref[...] = jnp.concatenate(outs, axis=0)                   # one store, (B*NCLS, HOUT)


def fused_forward_pallas(x, params2d, wcls):
    batch = x.shape[0]
    vmem = pl.BlockSpec(memory_space=pltpu.MemorySpace.VMEM)     # whole array in VMEM, no grid
    out = pl.pallas_call(
        fused_kernel,
        out_shape=jax.ShapeDtypeStruct((batch * NCLS, HOUT), jnp.float32),
        in_specs=[vmem, vmem, vmem],
        out_specs=vmem,
    )(x, params2d, wcls)
    return out.reshape(batch, NCLS, HOUT)


# ---------------------------------- host-side constants ----------------------------------
def design_biquad(lo, hi, fs):
    # TODO(synk): scipy cheb2ord/cheby2 design has no in-script equivalent; a deterministic
    # RBJ biquad bandpass with the same passband edges is used instead (the LTI lfilter
    # recursion itself is reproduced exactly via the impulse-response matrix below).
    f0 = 0.5 * (lo + hi)
    q = f0 / (hi - lo)
    w0 = 2.0 * np.pi * f0 / fs
    alpha = np.sin(w0) / (2.0 * q)
    bc = np.array([alpha, 0.0, -alpha], np.float64)
    ac = np.array([1.0 + alpha, -2.0 * np.cos(w0), 1.0 - alpha], np.float64)
    return (bc / ac[0]).astype(np.float32), (ac / ac[0]).astype(np.float32)


def impulse_response_matrix(bc, ac, n, pad):
    # Exact LTI equivalent of torchaudio.functional.lfilter with zero initial state:
    # y[t] = sum_{s<=t} h[t-s] x[s].  Output columns are zero-padded by `pad` on each side
    # so conv_time's time padding is folded in for free.
    h = np.zeros(n, np.float64)
    for t in range(n):
        v = bc[t] if t < 3 else 0.0
        if t >= 1:
            v -= ac[1] * h[t - 1]
        if t >= 2:
            v -= ac[2] * h[t - 2]
        h[t] = v
    m = np.zeros((n, n + 2 * pad), np.float32)
    for s in range(n):
        m[s, pad + s: pad + n] = h[: n - s]
    return m


# ---------------------------------- parameters ----------------------------------
def xavier_uniform(key, shape, fan_in, fan_out):
    bound = float(np.sqrt(6.0 / (fan_in + fan_out)))
    return jax.random.uniform(key, shape, jnp.float32, -bound, bound)


def init_params(key):
    k1, k2, k3, k4, k5 = jax.random.split(key, 5)
    p = {}

    # filterbank: biquad coefficients (for the reference) + impulse-response matrices (kernel)
    p['iir'] = [design_biquad(lo, hi, FS) for (lo, hi) in BANDS]
    p['filt'] = jnp.asarray(np.stack(
        [impulse_response_matrix(bc, ac, T, PAD) for (bc, ac) in p['iir']], axis=0))  # (FB,T,TP)

    # conv_time: torch weight (FT, FB, KT, 1), bias 0
    p['w_time'] = xavier_uniform(k1, (FT, FB, KT), FB * KT, FT * KT)
    p['b_time'] = jnp.zeros((FT,), jnp.float32)

    # conv_spat_power / conv_spat_conne: torch weight (F, 1, 1, C), no bias (batch_norm=True)
    p['wsp_p'] = xavier_uniform(k2, (F, C), C, F * C)
    p['wsp_c'] = xavier_uniform(k3, (F, C), C, F * C)

    # BatchNorm2d (eval): gamma=1, beta=0, running_mean=0, running_var=1
    for br in ('p', 'c'):
        p[f'bn_g_{br}'] = jnp.ones((F,), jnp.float32)
        p[f'bn_b_{br}'] = jnp.zeros((F,), jnp.float32)
        p[f'bn_m_{br}'] = jnp.zeros((F,), jnp.float32)
        p[f'bn_v_{br}'] = jnp.ones((F,), jnp.float32)

    # conv_power_classifier: weight (NCLS, F, FC_LEN, 1), bias 0
    p['w_cls_p'] = xavier_uniform(k4, (NCLS, F, FC_LEN), F * FC_LEN, NCLS * FC_LEN)
    p['b_cls_p'] = jnp.zeros((NCLS,), jnp.float32)

    # conv_conn_classifier: weight (NCLS, F, F, 1), bias 0
    p['w_cls_c'] = xavier_uniform(k5, (NCLS, F, F), F * F, NCLS * F)
    p['b_cls_c'] = jnp.zeros((NCLS,), jnp.float32)

    # AvgPool2d((POOL_LEN,1), stride (POOL_STR,1)) as a matmul matrix (T, T_POOL)
    pool_mat = np.zeros((T, T_POOL), np.float32)
    for i in range(T_POOL):
        pool_mat[i * POOL_STR: i * POOL_STR + POOL_LEN, i] = 1.0 / POOL_LEN
    p['pool_mat'] = jnp.asarray(pool_mat)
    return p


def fold_params(p):
    """Fold conv_time x conv_spat x eval-mode BatchNorm (+bias) into one (2F, M+1) matrix."""
    def bn_fold(g, bta, m, v):
        sc = g * jax.lax.rsqrt(v + BN_EPS)
        return sc, bta - m * sc

    wt = p['w_time'][:F]          # same_filters_for_features=True -> first F temporal filters
    bt = p['b_time'][:F]

    def branch(wsp, sc, sh):
        # w_eff[f, k, band, c] = w_time[f, band, k] * wsp[f, c]; flatten order matches the
        # in-kernel slab row order m = k*FB*C + band*C + c.
        w_eff = jnp.einsum('fbk,fc->fkbc', wt, wsp)
        w_fold = (sc[:, None, None, None] * w_eff).reshape(F, M)
        b_fold = sc * bt * jnp.sum(wsp, axis=1) + sh
        return w_fold, b_fold[:, None]

    sc_p, sh_p = bn_fold(p['bn_g_p'], p['bn_b_p'], p['bn_m_p'], p['bn_v_p'])
    sc_c, sh_c = bn_fold(p['bn_g_c'], p['bn_b_c'], p['bn_m_c'], p['bn_v_c'])
    wf_p, bf_p = branch(p['wsp_p'], sc_p, sh_p)
    wf_c, bf_c = branch(p['wsp_c'], sc_c, sh_c)
    w_aug = jnp.concatenate([jnp.concatenate([wf_p, wf_c], axis=0),
                             jnp.concatenate([bf_p, bf_c], axis=0)], axis=1)   # (2F, M+1)
    bias_full = jnp.concatenate([jnp.tile(p['b_cls_p'][:, None], (1, T_CLS)),
                                 jnp.tile(p['b_cls_c'][:, None], (1, N_WIN))],
                                axis=1)                                        # (NCLS, HOUT)
    return w_aug, bias_full


def pack_params(p):
    """Pack all constant tensors into ONE lane-aligned (P_ROWS,128) slab + ONE 3D weight."""
    w_aug, bias_full = fold_params(p)
    filt_wide = jnp.concatenate([p['filt'][i] for i in range(FB)], axis=1)     # (T, FB*TP)
    slab = jnp.zeros((P_ROWS, P_LANES), jnp.float32)
    slab = slab.at[ROW_FILT:ROW_FILT + T, 0:FB * TP].set(filt_wide)
    slab = slab.at[ROW_W:ROW_W + 2 * F, 0:M + 1].set(w_aug)
    slab = slab.at[ROW_POOL:ROW_POOL + T, 0:T_POOL].set(p['pool_mat'])
    slab = slab.at[ROW_BIAS:ROW_BIAS + NCLS, 0:HOUT].set(bias_full)
    wcls = jnp.concatenate([p['w_cls_p'], p['w_cls_c']], axis=2)               # (NCLS,F,FC_LEN+F)
    return slab, wcls


# ------------------------- pure-JAX layer-by-layer reference (test only) -------------------------
def reference_forward(x, p):
    hp = jax.lax.Precision.HIGHEST
    # filterbank: biquad IIR recursion (zero init, clamp) per band
    bands = []
    for (bc, ac) in p['iir']:
        b0, b1, b2 = float(bc[0]), float(bc[1]), float(bc[2])
        a1, a2 = float(ac[1]), float(ac[2])

        def step(carry, xt):
            x1, x2, y1, y2 = carry
            yt = b0 * xt + b1 * x1 + b2 * x2 - a1 * y1 - a2 * y2
            return (xt, x1, yt, y1), yt

        z0 = jnp.zeros(x.shape[:2], x.dtype)
        _, ys = jax.lax.scan(step, (z0, z0, z0, z0), jnp.moveaxis(x, -1, 0))
        bands.append(jnp.clip(jnp.moveaxis(ys, 0, -1), -1.0, 1.0))      # (B, C, T)
    xf = jnp.stack(bands, axis=1)                                       # (B, FB, C, T)
    xf_pad = jnp.pad(xf, ((0, 0), (0, 0), (0, 0), (PAD, PAD)))

    # conv_time
    shifts = jnp.stack([xf_pad[..., k:k + T] for k in range(KT)], axis=2)  # (B, FB, KT, C, T)
    ct = jnp.einsum('fnk,bnkct->bfct', p['w_time'][:F], shifts, precision=hp) \
        + p['b_time'][:F][None, :, None, None]

    def bn(z, g, bta, m, v):
        return (z - m[None, :, None]) * jax.lax.rsqrt(v[None, :, None] + BN_EPS) \
            * g[None, :, None] + bta[None, :, None]

    # power branch
    zp = bn(jnp.einsum('fc,bfct->bft', p['wsp_p'], ct, precision=hp),
            p['bn_g_p'], p['bn_b_p'], p['bn_m_p'], p['bn_v_p'])
    zp = zp * zp
    pooled = jnp.stack([zp[:, :, i * POOL_STR:i * POOL_STR + POOL_LEN].mean(-1)
                        for i in range(T_POOL)], axis=-1)
    pooled = jnp.log(jnp.maximum(pooled, SAFE_LOG_EPS))
    x1 = jnp.stack([jnp.einsum('nfk,bfk->bn', p['w_cls_p'],
                               pooled[:, :, t * FC_STR:t * FC_STR + FC_LEN], precision=hp)
                    for t in range(T_CLS)], axis=-1) + p['b_cls_p'][None, :, None]

    # coherence branch
    zc = bn(jnp.einsum('fc,bfct->bft', p['wsp_c'], ct, precision=hp),
            p['bn_g_c'], p['bn_b_c'], p['bn_m_c'], p['bn_v_c'])
    cols = []
    for wi in range(N_WIN):
        seg = zc[:, :, wi * WIN_STR:wi * WIN_STR + WIN_LEN]
        segc = seg - seg.mean(-1, keepdims=True)
        var = jnp.sum(segc * segc, axis=-1, keepdims=True)
        u = segc * jax.lax.rsqrt(var + 1e-12)
        corr = jnp.clip(jnp.einsum('bit,bjt->bij', u, u, precision=hp), -1.0, 1.0)
        cols.append(jnp.einsum('nij,bij->bn', p['w_cls_c'], corr, precision=hp))
    x2 = jnp.stack(cols, axis=-1) + p['b_cls_c'][None, :, None]

    xo = jnp.concatenate([x1, x2], axis=-1)
    return jax.nn.log_softmax(xo, axis=1)


if __name__ == "__main__":
    key = jax.random.PRNGKey(0)
    kx, kp = jax.random.split(key)
    x = jax.random.normal(kx, (B, C, T), jnp.float32)
    params = init_params(kp)

    # pack constants once, host-side (eval-mode: Dropout = identity, BN folded)
    params2d, wcls = pack_params(params)
    params2d = jax.block_until_ready(params2d)
    wcls = jax.block_until_ready(wcls)

    fwd = jax.jit(fused_forward_pallas)
    out = jax.block_until_ready(fwd(x, params2d, wcls))

    assert out.shape == (B, NCLS, HOUT), out.shape
    assert bool(jnp.all(jnp.isfinite(out)))

    ref = reference_forward(x, params)
    np.testing.assert_allclose(np.asarray(out), np.asarray(ref), rtol=2e-2, atol=2e-2)

    print("KERNEL_OK")
</pallas_src>

<mosaic_0001>
module attributes {stable_mosaic.version = 11 : i64} {
  func.func @fused_kernel(%arg0: memref<2x4x32xf32, #tpu.memory_space<vmem>>, %arg1: memref<88x128xf32, #tpu.memory_space<vmem>>, %arg2: memref<3x8x12xf32, #tpu.memory_space<vmem>>, %arg3: memref<6x4xf32, #tpu.memory_space<vmem>>) attributes {dimension_semantics = [], scalar_prefetch = 0 : i64, scratch_operands = 0 : i64, tpu.core_type = #tpu.core_type<tc>} {
    %c0 = arith.constant 0 : index
    %c0_0 = arith.constant 0 : index
    %0 = vector.load %arg1[%c0, %c0_0] : memref<88x128xf32, #tpu.memory_space<vmem>>, vector<32x72xf32>
    %c32 = arith.constant 32 : index
    %c0_1 = arith.constant 0 : index
    %1 = vector.load %arg1[%c32, %c0_1] : memref<88x128xf32, #tpu.memory_space<vmem>>, vector<16x41xf32>
    %c48 = arith.constant 48 : index
    %c0_2 = arith.constant 0 : index
    %2 = vector.load %arg1[%c48, %c0_2] : memref<88x128xf32, #tpu.memory_space<vmem>>, vector<32x7xf32>
    %c80 = arith.constant 80 : index
    %c0_3 = arith.constant 0 : index
    %3 = vector.load %arg1[%c80, %c0_3] : memref<88x128xf32, #tpu.memory_space<vmem>>, vector<3x4xf32>
    %c0_4 = arith.constant 0 : index
    %c0_5 = arith.constant 0 : index
    %c0_6 = arith.constant 0 : index
    %4 = vector.load %arg2[%c0_4, %c0_5, %c0_6] : memref<3x8x12xf32, #tpu.memory_space<vmem>>, vector<3x8x4xf32>
    %c0_7 = arith.constant 0 : index
    %c0_8 = arith.constant 0 : index
    %c4 = arith.constant 4 : index
    %5 = vector.load %arg2[%c0_7, %c0_8, %c4] : memref<3x8x12xf32, #tpu.memory_space<vmem>>, vector<3x8x8xf32>
    %cst = arith.constant 1.000000e+00 : f32
    %6 = vector.broadcast %cst : f32 to vector<1x32xf32>
    %c0_9 = arith.constant 0 : index
    %c0_10 = arith.constant 0 : index
    %c0_11 = arith.constant 0 : index
    %7 = vector.load %arg0[%c0_9, %c0_10, %c0_11] : memref<2x4x32xf32, #tpu.memory_space<vmem>>, vector<1x4x32xf32>
    %8 = vector.shape_cast %7 : vector<1x4x32xf32> to vector<4x32xf32>
    %cst_12 = arith.constant dense<0.000000e+00> : vector<4x72xf32>
    %9 = tpu.matmul %8, %0, %cst_12 {dimension_numbers = #tpu.dot_dimension_numbers<[1], [0], [0], [1], [0, 0, 1, 1], [], []>} : vector<4x32xf32>, vector<32x72xf32>, vector<4x72xf32> -> vector<4x72xf32>
    %cst_13 = arith.constant -1.000000e+00 : f32
    %cst_14 = arith.constant 1.000000e+00 : f32
    %10 = vector.broadcast %cst_13 : f32 to vector<4x72xf32>
    %11 = arith.maximumf %10, %9 : vector<4x72xf32>
    %12 = vector.broadcast %cst_14 : f32 to vector<4x72xf32>
    %13 = arith.minimumf %12, %11 : vector<4x72xf32>
    %14 = vector.extract_strided_slice %13 {offsets = [0, 0], sizes = [4, 36], strides = [1, 1]} : vector<4x72xf32> to vector<4x36xf32>
    %15 = vector.extract_strided_slice %13 {offsets = [0, 36], sizes = [4, 36], strides = [1, 1]} : vector<4x72xf32> to vector<4x36xf32>
    %16 = tpu.concatenate %14, %15 in 0 : vector<4x36xf32>, vector<4x36xf32> -> vector<8x36xf32>
    %17 = vector.extract_strided_slice %16 {offsets = [0, 0], sizes = [8, 32], strides = [1, 1]} : vector<8x36xf32> to vector<8x32xf32>
    %18 = vector.extract_strided_slice %16 {offsets = [0, 1], sizes = [8, 32], strides = [1, 1]} : vector<8x36xf32> to vector<8x32xf32>
    %19 = vector.extract_strided_slice %16 {offsets = [0, 2], sizes = [8, 32], strides = [1, 1]} : vector<8x36xf32> to vector<8x32xf32>
    %20 = vector.extract_strided_slice %16 {offsets = [0, 3], sizes = [8, 32], strides = [1, 1]} : vector<8x36xf32> to vector<8x32xf32>
    %21 = vector.extract_strided_slice %16 {offsets = [0, 4], sizes = [8, 32], strides = [1, 1]} : vector<8x36xf32> to vector<8x32xf32>
    %22 = tpu.concatenate %17, %18, %19, %20, %21, %6 in 0 : vector<8x32xf32>, vector<8x32xf32>, vector<8x32xf32>, vector<8x32xf32>, vector<8x32xf32>, vector<1x32xf32> -> vector<41x32xf32>
    %cst_15 = arith.constant dense<0.000000e+00> : vector<16x32xf32>
    %23 = tpu.matmul %1, %22, %cst_15 {dimension_numbers = #tpu.dot_dimension_numbers<[1], [0], [0], [1], [0, 0, 1, 1], [], []>} : vector<16x41xf32>, vector<41x32xf32>, vector<16x32xf32> -> vector<16x32xf32>
    %24 = vector.extract_strided_slice %23 {offsets = [0, 0], sizes = [8, 32], strides = [1, 1]} : vector<16x32xf32> to vector<8x32xf32>
    %25 = vector.extract_strided_slice %23 {offsets = [8, 0], sizes = [8, 32], strides = [1, 1]} : vector<16x32xf32> to vector<8x32xf32>
    %26 = arith.mulf %24, %24 : vector<8x32xf32>
    %cst_16 = arith.constant dense<0.000000e+00> : vector<8x7xf32>
    %27 = tpu.matmul %26, %2, %cst_16 {dimension_numbers = #tpu.dot_dimension_numbers<[1], [0], [0], [1], [0, 0, 1, 1], [], []>} : vector<8x32xf32>, vector<32x7xf32>, vector<8x7xf32> -> vector<8x7xf32>
    %cst_17 = arith.constant 9.99999997E-7 : f32
    %28 = vector.broadcast %cst_17 : f32 to vector<8x7xf32>
    %29 = arith.maximumf %27, %28 : vector<8x7xf32>
    %30 = math.log %29 : vector<8x7xf32>
    %31 = vector.extract_strided_slice %30 {offsets = [0, 0], sizes = [8, 4], strides = [1, 1]} : vector<8x7xf32> to vector<8x4xf32>
    %32 = vector.shape_cast %31 : vector<8x4xf32> to vector<1x8x4xf32>
    %33 = vector.broadcast %32 : vector<1x8x4xf32> to vector<3x8x4xf32>
    %34 = arith.mulf %4, %33 : vector<3x8x4xf32>
    %cst_18 = arith.constant dense<0.000000e+00> : vector<3x8xf32>
    %35 = vector.multi_reduction <add>, %34, %cst_18 [2] : vector<3x8x4xf32> to vector<3x8xf32>
    %cst_19 = arith.constant dense<0.000000e+00> : vector<3xf32>
    %36 = vector.multi_reduction <add>, %35, %cst_19 [1] : vector<3x8xf32> to vector<3xf32>
    %37 = vector.shape_cast %36 : vector<3xf32> to vector<3x1xf32>
    %38 = vector.extract_strided_slice %30 {offsets = [0, 2], sizes = [8, 4], strides = [1, 1]} : vector<8x7xf32> to vector<8x4xf32>
    %39 = vector.shape_cast %38 : vector<8x4xf32> to vector<1x8x4xf32>
    %40 = vector.broadcast %39 : vector<1x8x4xf32> to vector<3x8x4xf32>
    %41 = arith.mulf %4, %40 : vector<3x8x4xf32>
    %cst_20 = arith.constant dense<0.000000e+00> : vector<3x8xf32>
    %42 = vector.multi_reduction <add>, %41, %cst_20 [2] : vector<3x8x4xf32> to vector<3x8xf32>
    %cst_21 = arith.constant dense<0.000000e+00> : vector<3xf32>
    %43 = vector.multi_reduction <add>, %42, %cst_21 [1] : vector<3x8xf32> to vector<3xf32>
    %44 = vector.shape_cast %43 : vector<3xf32> to vector<3x1xf32>
    %45 = vector.extract_strided_slice %25 {offsets = [0, 0], sizes = [8, 16], strides = [1, 1]} : vector<8x32xf32> to vector<8x16xf32>
    %cst_22 = arith.constant dense<0.000000e+00> : vector<8xf32>
    %46 = vector.multi_reduction <add>, %45, %cst_22 [1] : vector<8x16xf32> to vector<8xf32>
    %47 = vector.shape_cast %46 : vector<8xf32> to vector<8x1xf32>
    %cst_23 = arith.constant 1.600000e+01 : f32
    %48 = vector.broadcast %cst_23 : f32 to vector<8x1xf32>
    %49 = arith.divf %47, %48 : vector<8x1xf32>
    %50 = vector.broadcast %49 : vector<8x1xf32> to vector<8x16xf32>
    %51 = arith.subf %45, %50 : vector<8x16xf32>
    %52 = arith.mulf %51, %51 : vector<8x16xf32>
    %cst_24 = arith.constant dense<0.000000e+00> : vector<8xf32>
    %53 = vector.multi_reduction <add>, %52, %cst_24 [1] : vector<8x16xf32> to vector<8xf32>
    %54 = vector.shape_cast %53 : vector<8xf32> to vector<8x1xf32>
    %cst_25 = arith.constant 9.99999996E-13 : f32
    %55 = vector.broadcast %cst_25 : f32 to vector<8x1xf32>
    %56 = arith.addf %54, %55 : vector<8x1xf32>
    %57 = math.rsqrt %56 : vector<8x1xf32>
    %58 = vector.broadcast %57 : vector<8x1xf32> to vector<8x16xf32>
    %59 = arith.mulf %51, %58 : vector<8x16xf32>
    %60 = tpu.transpose %59, [1, 0] : vector<8x16xf32> -> vector<16x8xf32>
    %cst_26 = arith.constant dense<0.000000e+00> : vector<8x8xf32>
    %61 = tpu.matmul %59, %60, %cst_26 {dimension_numbers = #tpu.dot_dimension_numbers<[1], [0], [0], [1], [0, 0, 1, 1], [], []>} : vector<8x16xf32>, vector<16x8xf32>, vector<8x8xf32> -> vector<8x8xf32>
    %cst_27 = arith.constant -1.000000e+00 : f32
    %cst_28 = arith.constant 1.000000e+00 : f32
    %62 = vector.broadcast %cst_27 : f32 to vector<8x8xf32>
    %63 = arith.maximumf %62, %61 : vector<8x8xf32>
    %64 = vector.broadcast %cst_28 : f32 to vector<8x8xf32>
    %65 = arith.minimumf %64, %63 : vector<8x8xf32>
    %66 = vector.shape_cast %65 : vector<8x8xf32> to vector<1x8x8xf32>
    %67 = vector.broadcast %66 : vector<1x8x8xf32> to vector<3x8x8xf32>
    %68 = arith.mulf %5, %67 : vector<3x8x8xf32>
    %cst_29 = arith.constant dense<0.000000e+00> : vector<3x8xf32>
    %69 = vector.multi_reduction <add>, %68, %cst_29 [2] : vector<3x8x8xf32> to vector<3x8xf32>
    %cst_30 = arith.constant dense<0.000000e+00> : vector<3xf32>
    %70 = vector.multi_reduction <add>, %69, %cst_30 [1] : vector<3x8xf32> to vector<3xf32>
    %71 = vector.shape_cast %70 : vector<3xf32> to vector<3x1xf32>
    %72 = vector.extract_strided_slice %25 {offsets = [0, 16], sizes = [8, 16], strides = [1, 1]} : vector<8x32xf32> to vector<8x16xf32>
    %cst_31 = arith.constant dense<0.000000e+00> : vector<8xf32>
    %73 = vector.multi_reduction <add>, %72, %cst_31 [1] : vector<8x16xf32> to vector<8xf32>
    %74 = vector.shape_cast %73 : vector<8xf32> to vector<8x1xf32>
    %cst_32 = arith.constant 1.600000e+01 : f32
    %75 = vector.broadcast %cst_32 : f32 to vector<8x1xf32>
    %76 = arith.divf %74, %75 : vector<8x1xf32>
    %77 = vector.broadcast %76 : vector<8x1xf32> to vector<8x16xf32>
    %78 = arith.subf %72, %77 : vector<8x16xf32>
    %79 = arith.mulf %78, %78 : vector<8x16xf32>
    %cst_33 = arith.constant dense<0.000000e+00> : vector<8xf32>
    %80 = vector.multi_reduction <add>, %79, %cst_33 [1] : vector<8x16xf32> to vector<8xf32>
    %81 = vector.shape_cast %80 : vector<8xf32> to vector<8x1xf32>
    %cst_34 = arith.constant 9.99999996E-13 : f32
    %82 = vector.broadcast %cst_34 : f32 to vector<8x1xf32>
    %83 = arith.addf %81, %82 : vector<8x1xf32>
    %84 = math.rsqrt %83 : vector<8x1xf32>
    %85 = vector.broadcast %84 : vector<8x1xf32> to vector<8x16xf32>
    %86 = arith.mulf %78, %85 : vector<8x16xf32>
    %87 = tpu.transpose %86, [1, 0] : vector<8x16xf32> -> vector<16x8xf32>
    %cst_35 = arith.constant dense<0.000000e+00> : vector<8x8xf32>
    %88 = tpu.matmul %86, %87, %cst_35 {dimension_numbers = #tpu.dot_dimension_numbers<[1], [0], [0], [1], [0, 0, 1, 1], [], []>} : vector<8x16xf32>, vector<16x8xf32>, vector<8x8xf32> -> vector<8x8xf32>
    %cst_36 = arith.constant -1.000000e+00 : f32
    %cst_37 = arith.constant 1.000000e+00 : f32
    %89 = vector.broadcast %cst_36 : f32 to vector<8x8xf32>
    %90 = arith.maximumf %89, %88 : vector<8x8xf32>
    %91 = vector.broadcast %cst_37 : f32 to vector<8x8xf32>
    %92 = arith.minimumf %91, %90 : vector<8x8xf32>
    %93 = vector.shape_cast %92 : vector<8x8xf32> to vector<1x8x8xf32>
    %94 = vector.broadcast %93 : vector<1x8x8xf32> to vector<3x8x8xf32>
    %95 = arith.mulf %5, %94 : vector<3x8x8xf32>
    %cst_38 = arith.constant dense<0.000000e+00> : vector<3x8xf32>
    %96 = vector.multi_reduction <add>, %95, %cst_38 [2] : vector<3x8x8xf32> to vector<3x8xf32>
    %cst_39 = arith.constant dense<0.000000e+00> : vector<3xf32>
    %97 = vector.multi_reduction <add>, %96, %cst_39 [1] : vector<3x8xf32> to vector<3xf32>
    %98 = vector.shape_cast %97 : vector<3xf32> to vector<3x1xf32>
    %99 = tpu.concatenate %37, %44, %71, %98 in 1 : vector<3x1xf32>, vector<3x1xf32>, vector<3x1xf32>, vector<3x1xf32> -> vector<3x4xf32>
    %100 = arith.addf %99, %3 : vector<3x4xf32>
    %cst_40 = arith.constant dense<0xFF800000> : vector<4xf32>
    %101 = vector.multi_reduction <maximumf>, %100, %cst_40 [0] : vector<3x4xf32> to vector<4xf32>
    %102 = vector.shape_cast %101 : vector<4xf32> to vector<1x4xf32>
    %103 = vector.broadcast %102 : vector<1x4xf32> to vector<3x4xf32>
    %104 = arith.subf %100, %103 : vector<3x4xf32>
    %105 = math.exp %104 : vector<3x4xf32>
    %cst_41 = arith.constant dense<0.000000e+00> : vector<4xf32>
    %106 = vector.multi_reduction <add>, %105, %cst_41 [0] : vector<3x4xf32> to vector<4xf32>
    %107 = vector.shape_cast %106 : vector<4xf32> to vector<1x4xf32>
    %108 = math.log %107 : vector<1x4xf32>
    %109 = arith.addf %102, %108 : vector<1x4xf32>
    %110 = vector.broadcast %109 : vector<1x4xf32> to vector<3x4xf32>
    %111 = arith.subf %100, %110 : vector<3x4xf32>
    %c1 = arith.constant 1 : index
    %c0_42 = arith.constant 0 : index
    %c0_43 = arith.constant 0 : index
    %112 = vector.load %arg0[%c1, %c0_42, %c0_43] : memref<2x4x32xf32, #tpu.memory_space<vmem>>, vector<1x4x32xf32>
    %113 = vector.shape_cast %112 : vector<1x4x32xf32> to vector<4x32xf32>
    %cst_44 = arith.constant dense<0.000000e+00> : vector<4x72xf32>
    %114 = tpu.matmul %113, %0, %cst_44 {dimension_numbers = #tpu.dot_dimension_numbers<[1], [0], [0], [1], [0, 0, 1, 1], [], []>} : vector<4x32xf32>, vector<32x72xf32>, vector<4x72xf32> -> vector<4x72xf32>
    %cst_45 = arith.constant -1.000000e+00 : f32
    %cst_46 = arith.constant 1.000000e+00 : f32
    %115 = vector.broadcast %cst_45 : f32 to vector<4x72xf32>
    %116 = arith.maximumf %115, %114 : vector<4x72xf32>
    %117 = vector.broadcast %cst_46 : f32 to vector<4x72xf32>
    %118 = arith.minimumf %117, %116 : vector<4x72xf32>
    %119 = vector.extract_strided_slice %118 {offsets = [0, 0], sizes = [4, 36], strides = [1, 1]} : vector<4x72xf32> to vector<4x36xf32>
    %120 = vector.extract_strided_slice %118 {offsets = [0, 36], sizes = [4, 36], strides = [1, 1]} : vector<4x72xf32> to vector<4x36xf32>
    %121 = tpu.concatenate %119, %120 in 0 : vector<4x36xf32>, vector<4x36xf32> -> vector<8x36xf32>
    %122 = vector.extract_strided_slice %121 {offsets = [0, 0], sizes = [8, 32], strides = [1, 1]} : vector<8x36xf32> to vector<8x32xf32>
    %123 = vector.extract_strided_slice %121 {offsets = [0, 1], sizes = [8, 32], strides = [1, 1]} : vector<8x36xf32> to vector<8x32xf32>
    %124 = vector.extract_strided_slice %121 {offsets = [0, 2], sizes = [8, 32], strides = [1, 1]} : vector<8x36xf32> to vector<8x32xf32>
    %125 = vector.extract_strided_slice %121 {offsets = [0, 3], sizes = [8, 32], strides = [1, 1]} : vector<8x36xf32> to vector<8x32xf32>
    %126 = vector.extract_strided_slice %121 {offsets = [0, 4], sizes = [8, 32], strides = [1, 1]} : vector<8x36xf32> to vector<8x32xf32>
    %127 = tpu.concatenate %122, %123, %124, %125, %126, %6 in 0 : vector<8x32xf32>, vector<8x32xf32>, vector<8x32xf32>, vector<8x32xf32>, vector<8x32xf32>, vector<1x32xf32> -> vector<41x32xf32>
    %cst_47 = arith.constant dense<0.000000e+00> : vector<16x32xf32>
    %128 = tpu.matmul %1, %127, %cst_47 {dimension_numbers = #tpu.dot_dimension_numbers<[1], [0], [0], [1], [0, 0, 1, 1], [], []>} : vector<16x41xf32>, vector<41x32xf32>, vector<16x32xf32> -> vector<16x32xf32>
    %129 = vector.extract_strided_slice %128 {offsets = [0, 0], sizes = [8, 32], strides = [1, 1]} : vector<16x32xf32> to vector<8x32xf32>
    %130 = vector.extract_strided_slice %128 {offsets = [8, 0], sizes = [8, 32], strides = [1, 1]} : vector<16x32xf32> to vector<8x32xf32>
    %131 = arith.mulf %129, %129 : vector<8x32xf32>
    %cst_48 = arith.constant dense<0.000000e+00> : vector<8x7xf32>
    %132 = tpu.matmul %131, %2, %cst_48 {dimension_numbers = #tpu.dot_dimension_numbers<[1], [0], [0], [1], [0, 0, 1, 1], [], []>} : vector<8x32xf32>, vector<32x7xf32>, vector<8x7xf32> -> vector<8x7xf32>
    %cst_49 = arith.constant 9.99999997E-7 : f32
    %133 = vector.broadcast %cst_49 : f32 to vector<8x7xf32>
    %134 = arith.maximumf %132, %133 : vector<8x7xf32>
    %135 = math.log %134 : vector<8x7xf32>
    %136 = vector.extract_strided_slice %135 {offsets = [0, 0], sizes = [8, 4], strides = [1, 1]} : vector<8x7xf32> to vector<8x4xf32>
    %137 = vector.shape_cast %136 : vector<8x4xf32> to vector<1x8x4xf32>
    %138 = vector.broadcast %137 : vector<1x8x4xf32> to vector<3x8x4xf32>
    %139 = arith.mulf %4, %138 : vector<3x8x4xf32>
    %cst_50 = arith.constant dense<0.000000e+00> : vector<3x8xf32>
    %140 = vector.multi_reduction <add>, %139, %cst_50 [2] : vector<3x8x4xf32> to vector<3x8xf32>
    %cst_51 = arith.constant dense<0.000000e+00> : vector<3xf32>
    %141 = vector.multi_reduction <add>, %140, %cst_51 [1] : vector<3x8xf32> to vector<3xf32>
    %142 = vector.shape_cast %141 : vector<3xf32> to vector<3x1xf32>
    %143 = vector.extract_strided_slice %135 {offsets = [0, 2], sizes = [8, 4], strides = [1, 1]} : vector<8x7xf32> to vector<8x4xf32>
    %144 = vector.shape_cast %143 : vector<8x4xf32> to vector<1x8x4xf32>
    %145 = vector.broadcast %144 : vector<1x8x4xf32> to vector<3x8x4xf32>
    %146 = arith.mulf %4, %145 : vector<3x8x4xf32>
    %cst_52 = arith.constant dense<0.000000e+00> : vector<3x8xf32>
    %147 = vector.multi_reduction <add>, %146, %cst_52 [2] : vector<3x8x4xf32> to vector<3x8xf32>
    %cst_53 = arith.constant dense<0.000000e+00> : vector<3xf32>
    %148 = vector.multi_reduction <add>, %147, %cst_53 [1] : vector<3x8xf32> to vector<3xf32>
    %149 = vector.shape_cast %148 : vector<3xf32> to vector<3x1xf32>
    %150 = vector.extract_strided_slice %130 {offsets = [0, 0], sizes = [8, 16], strides = [1, 1]} : vector<8x32xf32> to vector<8x16xf32>
    %cst_54 = arith.constant dense<0.000000e+00> : vector<8xf32>
    %151 = vector.multi_reduction <add>, %150, %cst_54 [1] : vector<8x16xf32> to vector<8xf32>
    %152 = vector.shape_cast %151 : vector<8xf32> to vector<8x1xf32>
    %cst_55 = arith.constant 1.600000e+01 : f32
    %153 = vector.broadcast %cst_55 : f32 to vector<8x1xf32>
    %154 = arith.divf %152, %153 : vector<8x1xf32>
    %155 = vector.broadcast %154 : vector<8x1xf32> to vector<8x16xf32>
    %156 = arith.subf %150, %155 : vector<8x16xf32>
    %157 = arith.mulf %156, %156 : vector<8x16xf32>
    %cst_56 = arith.constant dense<0.000000e+00> : vector<8xf32>
    %158 = vector.multi_reduction <add>, %157, %cst_56 [1] : vector<8x16xf32> to vector<8xf32>
    %159 = vector.shape_cast %158 : vector<8xf32> to vector<8x1xf32>
    %cst_57 = arith.constant 9.99999996E-13 : f32
    %160 = vector.broadcast %cst_57 : f32 to vector<8x1xf32>
    %161 = arith.addf %159, %160 : vector<8x1xf32>
    %162 = math.rsqrt %161 : vector<8x1xf32>
    %163 = vector.broadcast %162 : vector<8x1xf32> to vector<8x16xf32>
    %164 = arith.mulf %156, %163 : vector<8x16xf32>
    %165 = tpu.transpose %164, [1, 0] : vector<8x16xf32> -> vector<16x8xf32>
    %cst_58 = arith.constant dense<0.000000e+00> : vector<8x8xf32>
    %166 = tpu.matmul %164, %165, %cst_58 {dimension_numbers = #tpu.dot_dimension_numbers<[1], [0], [0], [1], [0, 0, 1, 1], [], []>} : vector<8x16xf32>, vector<16x8xf32>, vector<8x8xf32> -> vector<8x8xf32>
    %cst_59 = arith.constant -1.000000e+00 : f32
    %cst_60 = arith.constant 1.000000e+00 : f32
    %167 = vector.broadcast %cst_59 : f32 to vector<8x8xf32>
    %168 = arith.maximumf %167, %166 : vector<8x8xf32>
    %169 = vector.broadcast %cst_60 : f32 to vector<8x8xf32>
    %170 = arith.minimumf %169, %168 : vector<8x8xf32>
    %171 = vector.shape_cast %170 : vector<8x8xf32> to vector<1x8x8xf32>
    %172 = vector.broadcast %171 : vector<1x8x8xf32> to vector<3x8x8xf32>
    %173 = arith.mulf %5, %172 : vector<3x8x8xf32>
    %cst_61 = arith.constant dense<0.000000e+00> : vector<3x8xf32>
    %174 = vector.multi_reduction <add>, %173, %cst_61 [2] : vector<3x8x8xf32> to vector<3x8xf32>
    %cst_62 = arith.constant dense<0.000000e+00> : vector<3xf32>
    %175 = vector.multi_reduction <add>, %174, %cst_62 [1] : vector<3x8xf32> to vector<3xf32>
    %176 = vector.shape_cast %175 : vector<3xf32> to vector<3x1xf32>
    %177 = vector.extract_strided_slice %130 {offsets = [0, 16], sizes = [8, 16], strides = [1, 1]} : vector<8x32xf32> to vector<8x16xf32>
    %cst_63 = arith.constant dense<0.000000e+00> : vector<8xf32>
    %178 = vector.multi_reduction <add>, %177, %cst_63 [1] : vector<8x16xf32> to vector<8xf32>
    %179 = vector.shape_cast %178 : vector<8xf32> to vector<8x1xf32>
    %cst_64 = arith.constant 1.600000e+01 : f32
    %180 = vector.broadcast %cst_64 : f32 to vector<8x1xf32>
    %181 = arith.divf %179, %180 : vector<8x1xf32>
    %182 = vector.broadcast %181 : vector<8x1xf32> to vector<8x16xf32>
    %183 = arith.subf %177, %182 : vector<8x16xf32>
    %184 = arith.mulf %183, %183 : vector<8x16xf32>
    %cst_65 = arith.constant dense<0.000000e+00> : vector<8xf32>
    %185 = vector.multi_reduction <add>, %184, %cst_65 [1] : vector<8x16xf32> to vector<8xf32>
    %186 = vector.shape_cast %185 : vector<8xf32> to vector<8x1xf32>
    %cst_66 = arith.constant 9.99999996E-13 : f32
    %187 = vector.broadcast %cst_66 : f32 to vector<8x1xf32>
    %188 = arith.addf %186, %187 : vector<8x1xf32>
    %189 = math.rsqrt %188 : vector<8x1xf32>
    %190 = vector.broadcast %189 : vector<8x1xf32> to vector<8x16xf32>
    %191 = arith.mulf %183, %190 : vector<8x16xf32>
    %192 = tpu.transpose %191, [1, 0] : vector<8x16xf32> -> vector<16x8xf32>
    %cst_67 = arith.constant dense<0.000000e+00> : vector<8x8xf32>
    %193 = tpu.matmul %191, %192, %cst_67 {dimension_numbers = #tpu.dot_dimension_numbers<[1], [0], [0], [1], [0, 0, 1, 1], [], []>} : vector<8x16xf32>, vector<16x8xf32>, vector<8x8xf32> -> vector<8x8xf32>
    %cst_68 = arith.constant -1.000000e+00 : f32
    %cst_69 = arith.constant 1.000000e+00 : f32
    %194 = vector.broadcast %cst_68 : f32 to vector<8x8xf32>
    %195 = arith.maximumf %194, %193 : vector<8x8xf32>
    %196 = vector.broadcast %cst_69 : f32 to vector<8x8xf32>
    %197 = arith.minimumf %196, %195 : vector<8x8xf32>
    %198 = vector.shape_cast %197 : vector<8x8xf32> to vector<1x8x8xf32>
    %199 = vector.broadcast %198 : vector<1x8x8xf32> to vector<3x8x8xf32>
    %200 = arith.mulf %5, %199 : vector<3x8x8xf32>
    %cst_70 = arith.constant dense<0.000000e+00> : vector<3x8xf32>
    %201 = vector.multi_reduction <add>, %200, %cst_70 [2] : vector<3x8x8xf32> to vector<3x8xf32>
    %cst_71 = arith.constant dense<0.000000e+00> : vector<3xf32>
    %202 = vector.multi_reduction <add>, %201, %cst_71 [1] : vector<3x8xf32> to vector<3xf32>
    %203 = vector.shape_cast %202 : vector<3xf32> to vector<3x1xf32>
    %204 = tpu.concatenate %142, %149, %176, %203 in 1 : vector<3x1xf32>, vector<3x1xf32>, vector<3x1xf32>, vector<3x1xf32> -> vector<3x4xf32>
    %205 = arith.addf %204, %3 : vector<3x4xf32>
    %cst_72 = arith.constant dense<0xFF800000> : vector<4xf32>
    %206 = vector.multi_reduction <maximumf>, %205, %cst_72 [0] : vector<3x4xf32> to vector<4xf32>
    %207 = vector.shape_cast %206 : vector<4xf32> to vector<1x4xf32>
    %208 = vector.broadcast %207 : vector<1x4xf32> to vector<3x4xf32>
    %209 = arith.subf %205, %208 : vector<3x4xf32>
    %210 = math.exp %209 : vector<3x4xf32>
    %cst_73 = arith.constant dense<0.000000e+00> : vector<4xf32>
    %211 = vector.multi_reduction <add>, %210, %cst_73 [0] : vector<3x4xf32> to vector<4xf32>
    %212 = vector.shape_cast %211 : vector<4xf32> to vector<1x4xf32>
    %213 = math.log %212 : vector<1x4xf32>
    %214 = arith.addf %207, %213 : vector<1x4xf32>
    %215 = vector.broadcast %214 : vector<1x4xf32> to vector<3x4xf32>
    %216 = arith.subf %205, %215 : vector<3x4xf32>
    %217 = tpu.concatenate %111, %216 in 0 : vector<3x4xf32>, vector<3x4xf32> -> vector<6x4xf32>
    %c0_74 = arith.constant 0 : index
    %c0_75 = arith.constant 0 : index
    %218 = vector.load %arg3[%c0_74, %c0_75] : memref<6x4xf32, #tpu.memory_space<vmem>>, vector<6x4xf32>
    tpu.vector_store %arg3[%c0_74, %c0_75], %217 {strides = array<i32>} : memref<6x4xf32, #tpu.memory_space<vmem>>, vector<6x4xf32>,
    return
  }
}

</mosaic_0001>

<bundles_post_ra>
// kernel: fused_forward_pallas.1
= control target key start
LH: loop header
LB: loop body
LE: loop exit
PB: predicated region body
PF: predicated region fallthrough
CT: control target
= control target key end

     0   :  { %8 = vsyncpa [#allocation3], 0  ;;  %s1233_s0 = inlined_call_operand.hbm [shape: f32[2,4,32], index: 0, kind: input, shape index: {}]   ;;  %s1234_s1 = inlined_call_operand.hbm [shape: f32[88,128], index: 1, kind: input, shape index: {}]   ;;  %s1235_s2 = inlined_call_operand.hbm [shape: f32[3,8,12], index: 2, kind: input, shape index: {}]   ;;  %s1236_s3 = inlined_call_operand.vmem [shape: f32[6,4], index: 3, kind: output, shape index: {}]  }
   0x1   :  { %9 = vsyncpa [#allocation5], 0  ;;  %s27_s14 = sshll.u32 %s1234_s1, 4  ;;  %s966_s15 = smov [#allocation4]   ;;  %s28_s14 = int_to_ptr.hbm [resolvable:$true] %s27_s14 }
   0x2   :  { %s29_s16 = sshll.u32 %s966_s15, 4  ;;  %s14_s19 = sshll.u32 %s1233_s0, 4  ;;  %s30_s16 = int_to_ptr.vmem [resolvable:$true] %s29_s16  ;;  %s15_s19 = int_to_ptr.hbm [resolvable:$true] %s14_s19 }
   0x3   :  { %s967_s20 = smov 128   ;;  %s968_s21 = smov 8  }
   0x4   :  { %35 = dma.hbm_to_vmem [thread:$0]  %s28_s14, 1408, %s30_s16, [#allocation5], %s967_s20, %s967_s20, %s968_s21  }
   0x5   :  { %s969_s22 = smov [#allocation2]   ;;  %s970_s24 = smov 64  }
   0x6   :  { %s16_s23 = sshll.u32 %s969_s22, 4  ;;  %s971_s25 = smov 4   ;;  %s17_s23 = int_to_ptr.vmem [resolvable:$true] %s16_s23 }
   0x7   :  { %22 = dma.hbm_to_vmem [thread:$0]  %s15_s19, 128, %s17_s23, [#allocation3], %s970_s24, %s970_s24, %s971_s25  }
   0x8   :  { %s40_s27 = sshll.u32 %s1235_s2, 4  ;;  %s972_s28 = smov [#allocation6]   ;;  %s41_s27 = int_to_ptr.hbm [resolvable:$true] %s40_s27 }
   0x9   :  { %s42_s29 = sshll.u32 %s972_s28, 4  ;;  %s43_s29 = int_to_ptr.vmem [resolvable:$true] %s42_s29 }
   0xa   :  { %48 = dma.hbm_to_vmem [thread:$0]  %s41_s27, 384, %s43_s29, [#allocation5], %s967_s20, %s967_s20, %s968_s21  }
   0xb   :  { %962 = dma.done.wait [#allocation3], 128  }
   0xc   :  { %963 = vsyncadd [#allocation3], 4294967168 }
   0xd   :  { %964 = dma.done.wait [#allocation5], 1792  }
   0xe   :  { %965 = vsyncadd [#allocation5], 4294965504  ;;  %v64_v0 = vld [vmem:[#allocation4 + $0x18] sm:$0xff]  ;;  %v63_v1 = vld [vmem:[#allocation4 + $0x10] sm:$0xff]  ;;  %vm76_vm0 = vcmask 261120   ;;  %s973_s0 = smov 92  }
   0xf   :  { %92 = vmatpush.msra.mxu0 %v64_v0  ;;  %v62_v2 = vld [vmem:[#allocation4 + $0x8] sm:$0xff]  ;;  %v61_v3 = vld [vmem:[#allocation4] sm:$0xff]  ;;  %v75_v4 = vld [vmem:[#allocation2] sm:$0xf]  ;;  %vm107_vm1 = vcmask 1043456   ;;  %s974_s2 = smov 127  }
  0x10   :  { %v462_v5 = vld [vmem:[#allocation2 + $0x4] sm:$0xf]  ;;  %s975_s30 = smov 125   ;;  %s976_s4 = smov 124   ;;  %vm129_vm2 = vcmask 1040384   ;;  %v978_v14 = vmov 1.0  }
  0x11   :  { %93 = vmatpush.msra.mxu0 %v63_v1  ;;  %s977_s5 = smov 126   ;;  %831 = vmatpush.msk.msra.mxu1 %vm129_vm2, %v978_v14  ;;  %v65_v21 = vld [vmem:[#allocation4 + $0x20] sm:$0xff]  ;;  %vm122_vm3 = vcmask 334848   ;;  %v66_v22 = vld [vmem:[#allocation4 + $0x28] sm:$0xff]  ;;  %v1027_v25 = vld [vmem:[#allocation4 + $0x38] sm:$0xff]  ;;  %s979_s6 = smov 112  }
  0x12   :  { %v1022_v23 = vld [vmem:[#allocation4 + $0x48] sm:$0xff]  ;;  %v1024_v24 = vld [vmem:[#allocation4 + $0x40] sm:$0xff]  ;;  %v1030_v26 = vld [vmem:[#allocation4 + $0x30] sm:$0xff]  ;;  %vm241_vm4 = vcmask 130048   ;;  %v980_v40 = vmov 16.0   ;;  %vm186_vm6 = vcmask 31744  }
  0x13   :  { %94 = vmatpush.msra.mxu0 %v62_v2  ;;  %172 = vmatpush.msra.mxu2 %v1022_v23  ;;  %868 = vrcp.f32 %v980_v40 }
  0x15   :  { %95 = vmatpush.msra.mxu0 %v61_v3  ;;  %173 = vmatpush.msra.mxu2 %v1024_v24 }
  0x16   :  { %829 = vmatmul.msk.f32.vlgmr.msra.gmra.mxu0 %vm76_vm0, %v75_v4  ;;  %v1061_v4 = vld [vmem:[#allocation6] sm:$0xff] }
  0x17   :  { %478 = vmatpush.msrb.mxu0 %v64_v0  ;;  %174 = vmatpush.msra.mxu2 %v1027_v25 }
  0x19   :  { %479 = vmatpush.msrb.mxu0 %v63_v1  ;;  %175 = vmatpush.msra.mxu2 %v1030_v26  ;;  %v869_v41 = vpop.eup %868 }
  0x1a   :  { %v246_v42 = vmul.f32 16.0, %v869_v41  ;;  %vm250_vm5 = vweird.f32 %v869_v41 }
  0x1b   :  { %480 = vmatpush.msrb.mxu0 %v62_v2  ;;  %843 = vmatpush.msk.msrb.mxu2 %vm129_vm2, %v978_v14  ;;  %vm206_vm2 = vcmask 1042434  }
  0x1c   :  { %v247_v43 = vsub.f32 1.0, %v246_v42 }
  0x1d   :  { %481 = vmatpush.msrb.mxu0 %v61_v3 }
  0x1e   :  { %841 = vmatmul.msk.f32.vlgmr.msrb.gmra.mxu0 %vm76_vm0, %v462_v5  ;;  %v248_v44 = vmul.f32 %v869_v41, %v247_v43 }
  0x20   :  { %v249_v45 = vadd.f32 %v869_v41, %v248_v44 }
  0x22   :  { %v251_v46 = vsel %vm250_vm5, %v869_v41, %v249_v45 }
  0x93   :  { %v97_v6 = vpop.f32.mrf.mxu0 }
  0x94   :  { %v830_v7 = vclamps-f32 %v97_v6, 1.0 }
  0x96   :  { %v103_v8 = vrot.slane %v830_v7, 4 }
  0x98   :  { %104 = vrot.lane.b32.xlu0 %v103_v8, %s973_s0 }
  0x9b   :  { %v483_v9 = vpop.f32.mrf.mxu0 }
  0x9c   :  { %v842_v12 = vclamps-f32 %v483_v9, 1.0 }
  0x9e   :  { %v489_v13 = vrot.slane %v842_v12, 4 }
 0x10a   :  { %v105_v10 = vpop.permute.xlu0 %104 }
 0x10b   :  { %v108_v11 = vsel %vm107_vm1, %v830_v7, %v105_v10  ;;  %v1066_v7 = vld [vmem:[#allocation6 + $0x8] sm:$0xff] }
 0x10c   :  { %110 = vrot.lane.b32.xlu2 %v108_v11, %s974_s2  ;;  %116 = vrot.lane.b32.xlu1 %v108_v11, %s975_s30 }
 0x10d   :  { %119 = vrot.lane.b32.xlu0 %v108_v11, %s976_s4 }
 0x114   :  { %490 = vrot.lane.b32.xlu2 %v489_v13, %s973_s0  ;;  %113 = vrot.lane.b32.xlu1 %v108_v11, %s977_s5 }
 0x166   :  { %v111_v15 = vpop.permute.xlu2 %110 }
 0x16e   :  { %v491_v16 = vpop.permute.xlu2 %490 }
 0x16f   :  { %v493_v17 = vsel %vm107_vm1, %v842_v12, %v491_v16  ;;  %vm204_vm1 = vcmask 1041409  }
 0x170   :  { %498 = vrot.lane.b32.xlu2 %v493_v17, %s977_s5  ;;  %501 = vrot.lane.b32.xlu1 %v493_v17, %s975_s30 }
 0x171   :  { %504 = vrot.lane.b32.xlu0 %v493_v17, %s976_s4 }
 0x179   :  { %495 = vrot.lane.b32.xlu0 %v493_v17, %s974_s2 }
 0x17e   :  { %v117_v18 = vpop.permute.xlu1 %116 }
 0x17f   :  { %v120_v19 = vpop.permute.xlu0 %119 }
 0x180   :  { %144 = vmatpush.msra.mxu1 %v120_v19 }
 0x182   :  { %145 = vmatpush.msra.mxu1 %v117_v18 }
 0x186   :  { %v114_v20 = vpop.permute.xlu1 %113 }
 0x187   :  { %146 = vmatpush.msra.mxu1 %v114_v20 }
 0x189   :  { %147 = vmatpush.msra.mxu1 %v111_v15 }
 0x18b   :  { %148 = vmatpush.msra.mxu1 %v108_v11 }
 0x18c   :  { %832 = vmatmul.msk.f32.vlgmr.msra.gmra.mxu1 %vm122_vm3, %v65_v21 }
 0x194   :  { %833 = vmatmul.msk.f32.gmra.mxu1 %vm122_vm3, %v66_v22 }
 0x1ca   :  { %v499_v29 = vpop.permute.xlu2 %498 }
 0x1e2   :  { %v502_v28 = vpop.permute.xlu1 %501 }
 0x1e3   :  { %v505_v27 = vpop.permute.xlu0 %504 }
 0x1e4   :  { %518 = vmatpush.msrb.mxu2 %v505_v27 }
 0x1e6   :  { %519 = vmatpush.msrb.mxu2 %v502_v28 }
 0x1e8   :  { %520 = vmatpush.msrb.mxu2 %v499_v29 }
 0x1eb   :  { %v496_v30 = vpop.permute.xlu0 %495 }
 0x1ec   :  { %521 = vmatpush.msrb.mxu2 %v496_v30 }
 0x1ee   :  { %522 = vmatpush.msrb.mxu2 %v493_v17 }
 0x209   :  { %v150_v31 = vpop.f32.mrf.mxu1 }
 0x20a   :  { %v156_v32 = vmul.f32 %v150_v31, %v150_v31 }
 0x20c   :  { %834 = vmatmul.msk.f32.vlgmr.msra.gmra.mxu2 %vm76_vm0, %v156_v32 }
 0x211   :  { %v1036_v33 = vpop.f32.mrf.mxu1 }
 0x212   :  { %337 = vrot.lane.b32.xlu1 %v1036_v33, %s979_s6  ;;  %v242_v63 = vsel %vm241_vm4, %v1036_v33, 0.0 }
 0x214   :  { %844 = vmatmul.msk.f32.vlgmr.msrb.gmra.mxu2 %vm122_vm3, %v65_v21 }
 0x21c   :  { %845 = vmatmul.msk.f32.gmra.mxu2 %vm122_vm3, %v66_v22  ;;  %v1073_v22 = vld [vmem:[#allocation6 + $0x10] sm:$0xff]  ;;  %vm209_vm3 = vcmask 59392  }
 0x284   :  { %v338_v34 = vpop.permute.xlu1 %337 }
 0x285   :  { %v340_v35 = vsel %vm241_vm4, %v338_v34, 0.0 }
 0x286   :  { %341 = vadd.xlane.f32.xlu0 %v340_v35 }
 0x28f   :  { %v177_v36 = vpop.f32.mrf.mxu2 }
 0x290   :  { %v180_v60 = vmax.f32 %v177_v36, 1e-06 }
 0x292   :  { %870 = vlog2.f32 %v180_v60 }
 0x297   :  { %v1043_v37 = vpop.f32.mrf.mxu2 }
 0x298   :  { %v871_v1 = vpop.eup %870 }
 0x299   :  { %v1058_v2 = vmul.f32 0.6931472, %v871_v1 }
 0x29b   :  { %v183_v5 = vmul.f32 %v1058_v2, %v1061_v4  ;;  %v184_v8 = vmul.f32 %v1058_v2, %v1066_v7  ;;  %v185_v27 = vmul.f32 %v1058_v2, %v1073_v22 }
 0x29d   :  { %v187_v6 = vsel %vm186_vm6, %v183_v5, 0.0  ;;  %v190_v9 = vsel %vm186_vm6, %v184_v8, 0.0  ;;  %v193_v28 = vsel %vm186_vm6, %v185_v27, 0.0 }
 0x29f   :  { %v527_v38 = vpop.f32.mrf.mxu2 }
 0x2a0   :  { %696 = vrot.lane.b32.xlu2 %v527_v38, %s979_s6  ;;  %v609_v39 = vsel %vm241_vm4, %v527_v38, 0.0 }
 0x2a1   :  { %610 = vadd.xlane.f32.xlu0 %v609_v39 }
 0x2f9   :  { %v342_v47 = vpop.xlane.xlu0 %341 }
 0x2fa   :  { %v343_v48 = vmul.f32 %v342_v47, %v251_v46  ;;  %v697_v49 = vpop.permute.xlu2 %696 }
 0x2fb   :  { %v699_v50 = vsel %vm241_vm4, %v697_v49, 0.0 }
 0x2fc   :  { %v344_v51 = vsub.f32 %v1036_v33, %v343_v48  ;;  %700 = vadd.xlane.f32.xlu1 %v699_v50 }
 0x2fe   :  { %v345_v52 = vmul.f32 %v344_v51, %v344_v51 }
 0x300   :  { %347 = vrot.lane.b32.xlu2 %v345_v52, %s979_s6 }
 0x314   :  { %v611_v59 = vpop.xlane.xlu0 %610 }
 0x315   :  { %v612_v61 = vmul.f32 %v611_v59, %v251_v46 }
 0x317   :  { %v613_v62 = vsub.f32 %v527_v38, %v612_v61 }
 0x319   :  { %v614_v0 = vmul.f32 %v613_v62, %v613_v62 }
 0x31b   :  { %v615_v3 = vsel %vm241_vm4, %v614_v0, 0.0 }
 0x35a   :  { %v348_v53 = vpop.permute.xlu2 %347 }
 0x35b   :  { %v350_v54 = vsel %vm241_vm4, %v348_v53, 0.0 }
 0x35c   :  { %351 = vadd.xlane.f32.xlu1 %v350_v54 }
 0x36f   :  { %v701_v55 = vpop.xlane.xlu1 %700 }
 0x370   :  { %v702_v56 = vmul.f32 %v701_v55, %v251_v46 }
 0x372   :  { %v1051_v57 = vsub.f32 %v527_v38, %v702_v56  ;;  %v199_v56 = vlaneseq }
 0x374   :  { %v704_v58 = vmul.f32 %v1051_v57, %v1051_v57  ;;  %v1090_v60 = vand.u32 127, %v199_v56 }
 0x376   :  { %706 = vrot.lane.b32.xlu2 %v704_v58, %s979_s6 }
 0x39f   :  { %243 = vadd.xlane.f32.xlu2 %v242_v63 }
 0x3a7   :  { %616 = vadd.xlane.f32.xlu2 %v615_v3 }
 0x3af   :  { %188 = vadd.xlane.f32.xlu2 %v187_v6 }
 0x3b7   :  { %191 = vadd.xlane.f32.xlu2 %v190_v9 }
 0x3cf   :  { %v352_v10 = vpop.xlane.xlu1 %351 }
 0x3d0   :  { %v353_v11 = vadd.f32 1e-12, %v352_v10  ;;  %v707_v12 = vpop.permute.xlu2 %706 }
 0x3d1   :  { %v709_v13 = vsel %vm241_vm4, %v707_v12, 0.0 }
 0x3d2   :  { %872 = vrsqrt.f32 %v353_v11  ;;  %710 = vadd.xlane.f32.xlu0 %v709_v13  ;;  %vm360_vm8 = vweird.f32 %v353_v11 }
 0x3d8   :  { %v873_v14 = vpop.eup %872 }
 0x3d9   :  { %v355_v15 = vmul.f32 %v873_v14, %v353_v11  ;;  %vm361_vm7 = vweird.f32 %v873_v14 }
 0x3da   :  { %vm362_vm9 = vmor %vm360_vm8, %vm361_vm7 }
 0x3db   :  { %v356_v16 = vmul.f32 %v873_v14, %v355_v15  ;;  %v530_v15 = vmul.f32 %v1043_v37, %v1043_v37 }
 0x3dd   :  { %v357_v17 = vmul.f32 0.5, %v356_v16 }
 0x3df   :  { %v358_v18 = vsub.f32 1.5, %v357_v17 }
 0x3e1   :  { %v359_v19 = vmul.f32 %v873_v14, %v358_v18 }
 0x3e3   :  { %v363_v20 = vsel %vm362_vm9, %v873_v14, %v359_v19  ;;  %vm436_vm9 = vcmask 23552  }
 0x3e4   :  { %v364_v21 = vmul.f32 %v363_v20, %v344_v51 }
 0x3e6   :  { %366 = vrot.lane.b32.xlu0 %v364_v21, %s979_s6 }
 0x410   :  { %194 = vadd.xlane.f32.xlu0 %v193_v28 }
 0x412   :  { %v244_v29 = vpop.xlane.xlu2 %243 }
 0x413   :  { %v252_v30 = vmul.f32 %v251_v46, %v244_v29 }
 0x415   :  { %v1079_v31 = vsub.f32 %v1036_v33, %v252_v30 }
 0x417   :  { %v254_v32 = vmul.f32 %v1079_v31, %v1079_v31 }
 0x419   :  { %v255_v34 = vsel %vm241_vm4, %v254_v32, 0.0 }
 0x41a   :  { %256 = vadd.xlane.f32.xlu1 %v255_v34  ;;  %v617_v35 = vpop.xlane.xlu2 %616 }
 0x41b   :  { %v618_v36 = vadd.f32 1e-12, %v617_v35 }
 0x41d   :  { %874 = vrsqrt.f32 %v618_v36  ;;  %vm625_vm11 = vweird.f32 %v618_v36 }
 0x422   :  { %v189_v55 = vpop.xlane.xlu2 %188 }
 0x423   :  { %v875_v38 = vpop.eup %874 }
 0x424   :  { %v620_v39 = vmul.f32 %v875_v38, %v618_v36  ;;  %vm626_vm10 = vweird.f32 %v875_v38 }
 0x425   :  { %vm627_vm12 = vmor %vm625_vm11, %vm626_vm10  ;;  %vm439_vm10 = vcmask 26624   ;;  %vm819_vm11 = vcmask 1042432  }
 0x426   :  { %v621_v40 = vmul.f32 %v875_v38, %v620_v39 }
 0x428   :  { %v622_v41 = vmul.f32 0.5, %v621_v40 }
 0x42a   :  { %v623_v42 = vsub.f32 1.5, %v622_v41  ;;  %v192_v59 = vpop.xlane.xlu2 %191 }
 0x42b   :  { %v202_v61 = vperm.slane %v192_v59, %v1090_v60 }
 0x42c   :  { %v624_v43 = vmul.f32 %v875_v38, %v623_v42 }
 0x42e   :  { %v628_v33 = vsel %vm627_vm12, %v875_v38, %v624_v43  ;;  %vm821_vm12 = vcmask 29696  }
 0x42f   :  { %v629_v44 = vmul.f32 %v628_v33, %v613_v62  ;;  %v201_v62 = vperm.slane %v189_v55, %v1090_v60 }
 0x431   :  { %847 = vmatpush.xpose.msk.msra.mxu0 %vm241_vm4, %v629_v44  ;;  %v205_v0 = vsel %vm204_vm1, %v202_v61, %v201_v62 }
 0x434   :  { %848 = vmatmul.msk.f32.vlgmr.msra.gmra.mxu0 %vm241_vm4, %v629_v44 }
 0x445   :  { %v711_v45 = vpop.xlane.xlu0 %710 }
 0x446   :  { %v712_v46 = vadd.f32 1e-12, %v711_v45 }
 0x448   :  { %876 = vrsqrt.f32 %v712_v46  ;;  %vm719_vm14 = vweird.f32 %v712_v46 }
 0x44e   :  { %v877_v47 = vpop.eup %876 }
 0x44f   :  { %v714_v48 = vmul.f32 %v877_v47, %v712_v46  ;;  %vm720_vm13 = vweird.f32 %v877_v47 }
 0x450   :  { %vm721_vm15 = vmor %vm719_vm14, %vm720_vm13 }
 0x451   :  { %v715_v49 = vmul.f32 %v877_v47, %v714_v48 }
 0x453   :  { %v716_v50 = vmul.f32 0.5, %v715_v49 }
 0x455   :  { %v717_v51 = vsub.f32 1.5, %v716_v50 }
 0x457   :  { %v718_v52 = vmul.f32 %v877_v47, %v717_v51 }
 0x458   :  { %v367_v58 = vpop.permute.xlu0 %366 }
 0x459   :  { %v722_v53 = vsel %vm721_vm15, %v877_v47, %v718_v52 }
 0x45a   :  { %v723_v54 = vmul.f32 %v722_v53, %v1051_v57 }
 0x45c   :  { %725 = vrot.lane.b32.xlu1 %v723_v54, %s979_s6 }
 0x464   :  { %214 = vrot.lane.b32.xlu1 %v1058_v2, %s977_s5 }
 0x483   :  { %v195_v63 = vpop.xlane.xlu0 %194 }
 0x484   :  { %v203_v57 = vperm.slane %v195_v63, %v1090_v60 }
 0x486   :  { %v207_v1 = vsel %vm206_vm2, %v203_v57, %v205_v0 }
 0x487   :  { %v210_v2 = vsel %vm209_vm3, %v207_v1, 0.0 }
 0x488   :  { %211 = vadd.xlane.f32.xlu2 %v210_v2 }
 0x48d   :  { %v257_v3 = vpop.xlane.xlu1 %256 }
 0x48e   :  { %v258_v5 = vadd.f32 1e-12, %v257_v3 }
 0x490   :  { %878 = vrsqrt.f32 %v258_v5  ;;  %vm265_vm7 = vweird.f32 %v258_v5 }
 0x496   :  { %v879_v6 = vpop.eup %878 }
 0x497   :  { %v260_v8 = vmul.f32 %v879_v6, %v258_v5  ;;  %vm266_vm5 = vweird.f32 %v879_v6 }
 0x498   :  { %vm267_vm8 = vmor %vm265_vm7, %vm266_vm5 }
 0x499   :  { %v261_v9 = vmul.f32 %v879_v6, %v260_v8 }
 0x49b   :  { %v262_v10 = vmul.f32 0.5, %v261_v9 }
 0x49d   :  { %v263_v11 = vsub.f32 1.5, %v262_v10 }
 0x49f   :  { %v264_v12 = vmul.f32 %v879_v6, %v263_v11 }
 0x4a1   :  { %v268_v13 = vsel %vm267_vm8, %v879_v6, %v264_v12 }
 0x4a2   :  { %v269_v14 = vmul.f32 %v268_v13, %v1079_v31 }
 0x4a4   :  { %835 = vmatpush.xpose.msk.msra.mxu3 %vm241_vm4, %v269_v14 }
 0x4a7   :  { %836 = vmatmul.msk.f32.vlgmr.msra.gmra.mxu3 %vm241_vm4, %v269_v14 }
 0x4a8   :  { %838 = vmatpush.xpose.msk.msrb.mxu3 %vm241_vm4, %v367_v58 }
 0x4ac   :  { %546 = vmatpush.msra.mxu3 %v1022_v23 }
 0x4ae   :  { %547 = vmatpush.msra.mxu3 %v1024_v24 }
 0x4af   :  { %839 = vmatmul.msk.f32.vlgmr.msrb.gmra.mxu3 %vm241_vm4, %v367_v58 }
 0x4b0   :  { %548 = vmatpush.msra.mxu3 %v1027_v25 }
 0x4b1   :  { %v650_v43 = vpop.f32.mrf.mxu0 }
 0x4b2   :  { %549 = vmatpush.msra.mxu3 %v1030_v26  ;;  %v849_v44 = vclamps-f32 %v650_v43, 1.0 }
 0x4b7   :  { %846 = vmatmul.msk.f32.vlgmr.msra.gmra.mxu3 %vm76_vm0, %v530_v15  ;;  %vm314_vm0 = vcmask 64512  }
 0x4ce   :  { %v726_v16 = vpop.permute.xlu1 %725 }
 0x4cf   :  { %850 = vmatpush.xpose.msk.msrb.mxu1 %vm241_vm4, %v726_v16 }
 0x4d2   :  { %851 = vmatmul.msk.f32.vlgmr.msrb.gmra.mxu1 %vm241_vm4, %v726_v16  ;;  %vm432_vm4 = vcmask 7168  }
 0x4d6   :  { %v215_v17 = vpop.permute.xlu1 %214 }
 0x4d7   :  { %v218_v23 = vmul.f32 %v215_v17, %v1066_v7  ;;  %v217_v24 = vmul.f32 %v215_v17, %v1061_v4  ;;  %v219_v37 = vmul.f32 %v215_v17, %v1073_v22 }
 0x4d9   :  { %v223_v25 = vsel %vm186_vm6, %v218_v23, 0.0  ;;  %v220_v26 = vsel %vm186_vm6, %v217_v24, 0.0  ;;  %v226_v18 = vsel %vm186_vm6, %v219_v37, 0.0 }
 0x4da   :  { %224 = vadd.xlane.f32.xlu1 %v223_v25  ;;  %221 = vadd.xlane.f32.xlu2 %v220_v26 }
 0x4e2   :  { %227 = vadd.xlane.f32.xlu2 %v226_v18 }
 0x4fb   :  { %v1118_v19 = vpop.xlane.xlu2 %211 }
 0x52a   :  { %v290_v35 = vpop.f32.mrf.mxu3 }
 0x52b   :  { %v837_v36 = vclamps-f32 %v290_v35, 1.0 }
 0x532   :  { %v387_v33 = vpop.f32.mrf.mxu3 }
 0x533   :  { %v840_v45 = vclamps-f32 %v387_v33, 1.0 }
 0x53a   :  { %v551_v56 = vpop.f32.mrf.mxu3 }
 0x53b   :  { %v554_v58 = vmax.f32 %v551_v56, 1e-06 }
 0x53d   :  { %880 = vlog2.f32 %v554_v58 }
 0x543   :  { %v881_v62 = vpop.eup %880 }
 0x544   :  { %v556_v63 = vmul.f32 0.6931472, %v881_v62 }
 0x546   :  { %v557_v3 = vmul.f32 %v556_v63, %v1061_v4  ;;  %v558_v6 = vmul.f32 %v556_v63, %v1066_v7 }
 0x548   :  { %v560_v5 = vsel %vm186_vm6, %v557_v3, 0.0  ;;  %v563_v8 = vsel %vm186_vm6, %v558_v6, 0.0 }
 0x54d   :  { %v222_v20 = vpop.xlane.xlu2 %221  ;;  %v225_v21 = vpop.xlane.xlu1 %224 }
 0x54e   :  { %v233_v27 = vperm.slane %v225_v21, %v1090_v60  ;;  %v232_v28 = vperm.slane %v222_v20, %v1090_v60 }
 0x54f   :  { %v746_v46 = vpop.f32.mrf.mxu1 }
 0x550   :  { %v235_v31 = vsel %vm204_vm1, %v233_v27, %v232_v28  ;;  %v852_v47 = vclamps-f32 %v746_v46, 1.0  ;;  %v559_v28 = vmul.f32 %v556_v63, %v1073_v22 }
 0x555   :  { %v228_v29 = vpop.xlane.xlu2 %227 }
 0x556   :  { %v234_v30 = vperm.slane %v228_v29, %v1090_v60 }
 0x558   :  { %v236_v32 = vsel %vm206_vm2, %v234_v30, %v235_v31  ;;  %v566_v30 = vsel %vm186_vm6, %v559_v28, 0.0 }
 0x559   :  { %v238_v34 = vsel %vm209_vm3, %v236_v32, 0.0 }
 0x55a   :  { %239 = vadd.xlane.f32.xlu2 %v238_v34 }
 0x572   :  { %296 = vrot.lane.b32.xlu2 %v837_v36, %s971_s25 }
 0x5cd   :  { %v1127_v38 = vpop.xlane.xlu2 %239 }
 0x5d5   :  { %v297_v39 = vpop.permute.xlu2 %296 }
 0x5d6   :  { %v299_v40 = vmul.f32 %v297_v39, %v1061_v4  ;;  %v300_v41 = vmul.f32 %v297_v39, %v1066_v7  ;;  %v301_v42 = vmul.f32 %v297_v39, %v1073_v22 }
 0x5d8   :  { %309 = vrot.lane.b32.xlu2 %v301_v42, %s976_s4  ;;  %307 = vrot.lane.b32.xlu1 %v300_v41, %s976_s4 }
 0x5d9   :  { %305 = vrot.lane.b32.xlu0 %v299_v40, %s976_s4 }
 0x5e0   :  { %656 = vrot.lane.b32.xlu2 %v849_v44, %s971_s25  ;;  %393 = vrot.lane.b32.xlu1 %v840_v45, %s971_s25 }
 0x5e8   :  { %752 = vrot.lane.b32.xlu2 %v852_v47, %s971_s25 }
 0x632   :  { %v310_v48 = vpop.permute.xlu2 %309 }
 0x633   :  { %v321_v49 = vsel %vm314_vm0, %v310_v48, 0.0 }
 0x634   :  { %322 = vadd.xlane.f32.xlu1 %v321_v49  ;;  %v433_v49 = vsel %vm432_vm4, %v1118_v19, %v1127_v38 }
 0x63a   :  { %v657_v50 = vpop.permute.xlu2 %656 }
 0x63b   :  { %v661_v52 = vmul.f32 %v657_v50, %v1073_v22  ;;  %v660_v57 = vmul.f32 %v657_v50, %v1066_v7  ;;  %v659_v0 = vmul.f32 %v657_v50, %v1061_v4 }
 0x642   :  { %v753_v9 = vpop.permute.xlu2 %752 }
 0x643   :  { %v755_v10 = vmul.f32 %v753_v9, %v1061_v4  ;;  %v756_v11 = vmul.f32 %v753_v9, %v1066_v7  ;;  %v757_v12 = vmul.f32 %v753_v9, %v1073_v22 }
 0x64a   :  { %v308_v51 = vpop.permute.xlu1 %307 }
 0x64b   :  { %v306_v53 = vpop.permute.xlu0 %305  ;;  %v318_v54 = vsel %vm314_vm0, %v308_v51, 0.0 }
 0x64c   :  { %319 = vadd.xlane.f32.xlu2 %v318_v54  ;;  %v315_v55 = vsel %vm314_vm0, %v306_v53, 0.0 }
 0x64d   :  { %316 = vadd.xlane.f32.xlu0 %v315_v55  ;;  %669 = vrot.lane.b32.xlu1 %v661_v52, %s976_s4 }
 0x652   :  { %v394_v59 = vpop.permute.xlu1 %393 }
 0x653   :  { %v397_v61 = vmul.f32 %v394_v59, %v1066_v7  ;;  %v396_v1 = vmul.f32 %v394_v59, %v1061_v4  ;;  %v398_v2 = vmul.f32 %v394_v59, %v1073_v22 }
 0x655   :  { %404 = vrot.lane.b32.xlu1 %v397_v61, %s976_s4 }
 0x661   :  { %582 = vrot.lane.b32.xlu0 %v556_v63, %s977_s5 }
 0x664   :  { %667 = vrot.lane.b32.xlu2 %v660_v57, %s976_s4 }
 0x669   :  { %665 = vrot.lane.b32.xlu0 %v659_v0, %s976_s4 }
 0x66c   :  { %402 = vrot.lane.b32.xlu2 %v396_v1, %s976_s4 }
 0x671   :  { %406 = vrot.lane.b32.xlu0 %v398_v2, %s976_s4 }
 0x67f   :  { %561 = vadd.xlane.f32.xlu1 %v560_v5 }
 0x69b   :  { %564 = vadd.xlane.f32.xlu0 %v563_v8 }
 0x6a7   :  { %v323_v13 = vpop.xlane.xlu1 %322 }
 0x6a8   :  { %v329_v23 = vperm.slane %v323_v13, %v1090_v60 }
 0x6af   :  { %761 = vrot.lane.b32.xlu0 %v755_v10, %s976_s4 }
 0x6b7   :  { %763 = vrot.lane.b32.xlu0 %v756_v11, %s976_s4 }
 0x6bf   :  { %765 = vrot.lane.b32.xlu0 %v757_v12, %s976_s4  ;;  %v320_v14 = vpop.xlane.xlu2 %319  ;;  %v670_v35 = vpop.permute.xlu1 %669 }
 0x6c0   :  { %v328_v15 = vperm.slane %v320_v14, %v1090_v60  ;;  %v317_v16 = vpop.xlane.xlu0 %316  ;;  %v680_v36 = vsel %vm314_vm0, %v670_v35, 0.0 }
 0x6c1   :  { %v327_v17 = vperm.slane %v317_v16, %v1090_v60 }
 0x6c3   :  { %v330_v24 = vsel %vm204_vm1, %v328_v15, %v327_v17 }
 0x6c4   :  { %v331_v25 = vsel %vm206_vm2, %v329_v23, %v330_v24 }
 0x6c5   :  { %v333_v26 = vsel %vm209_vm3, %v331_v25, 0.0 }
 0x6c6   :  { %334 = vadd.xlane.f32.xlu2 %v333_v26 }
 0x6c7   :  { %v668_v32 = vpop.permute.xlu2 %667  ;;  %v405_v45 = vpop.permute.xlu1 %404 }
 0x6c8   :  { %v414_v47 = vsel %vm314_vm0, %v405_v45, 0.0 }
 0x6cf   :  { %v403_v43 = vpop.permute.xlu2 %402 }
 0x6d3   :  { %v583_v37 = vpop.permute.xlu0 %582 }
 0x6d4   :  { %v586_v18 = vmul.f32 %v583_v37, %v1066_v7  ;;  %v585_v20 = vmul.f32 %v583_v37, %v1061_v4  ;;  %v587_v7 = vmul.f32 %v583_v37, %v1073_v22  ;;  %v677_v4 = vsel %vm314_vm0, %v668_v32, 0.0 }
 0x6d5   :  { %v411_v22 = vsel %vm314_vm0, %v403_v43, 0.0 }
 0x6d6   :  { %v591_v21 = vsel %vm186_vm6, %v586_v18, 0.0  ;;  %v588_v27 = vsel %vm186_vm6, %v585_v20, 0.0  ;;  %v594_v34 = vsel %vm186_vm6, %v587_v7, 0.0  ;;  %vm434_vm6 = vcmask 15360  }
 0x6d7   :  { %592 = vadd.xlane.f32.xlu1 %v591_v21  ;;  %589 = vadd.xlane.f32.xlu2 %v588_v27 }
 0x6db   :  { %v666_v29 = vpop.permute.xlu0 %665 }
 0x6dc   :  { %v674_v31 = vsel %vm314_vm0, %v666_v29, 0.0 }
 0x6df   :  { %567 = vadd.xlane.f32.xlu2 %v566_v30  ;;  %675 = vadd.xlane.f32.xlu1 %v674_v31 }
 0x6e3   :  { %v407_v39 = vpop.permute.xlu0 %406 }
 0x6e4   :  { %v417_v52 = vsel %vm314_vm0, %v407_v39, 0.0 }
 0x6e7   :  { %678 = vadd.xlane.f32.xlu2 %v677_v4 }
 0x6e9   :  { %595 = vadd.xlane.f32.xlu0 %v594_v34 }
 0x6f1   :  { %681 = vadd.xlane.f32.xlu0 %v680_v36 }
 0x6f2   :  { %v562_v54 = vpop.xlane.xlu1 %561 }
 0x6f3   :  { %v572_v56 = vperm.slane %v562_v54, %v1090_v60 }
 0x70e   :  { %v565_v40 = vpop.xlane.xlu0 %564 }
 0x70f   :  { %v573_v55 = vperm.slane %v565_v40, %v1090_v60  ;;  %v71_v40 = vld [vmem:[#allocation4 + $0x50] sm:$0x7] }
 0x711   :  { %v575_v61 = vsel %vm204_vm1, %v573_v55, %v572_v56 }
 0x721   :  { %v762_v41 = vpop.permute.xlu0 %761 }
 0x722   :  { %v770_v42 = vsel %vm314_vm0, %v762_v41, 0.0 }
 0x723   :  { %771 = vadd.xlane.f32.xlu1 %v770_v42 }
 0x729   :  { %v764_v33 = vpop.permute.xlu0 %763 }
 0x72a   :  { %v773_v44 = vsel %vm314_vm0, %v764_v33, 0.0 }
 0x72b   :  { %412 = vadd.xlane.f32.xlu1 %v411_v22  ;;  %774 = vadd.xlane.f32.xlu2 %v773_v44 }
 0x731   :  { %v766_v46 = vpop.permute.xlu0 %765 }
 0x732   :  { %v776_v48 = vsel %vm314_vm0, %v766_v46, 0.0 }
 0x733   :  { %415 = vadd.xlane.f32.xlu2 %v414_v47  ;;  %777 = vadd.xlane.f32.xlu0 %v776_v48 }
 0x739   :  { %v335_v50 = vpop.xlane.xlu2 %334 }
 0x73a   :  { %v1190_v51 = vsel %vm434_vm6, %v433_v49, %v335_v50 }
 0x73b   :  { %418 = vadd.xlane.f32.xlu0 %v417_v52 }
 0x74a   :  { %v590_v53 = vpop.xlane.xlu2 %589  ;;  %v593_v62 = vpop.xlane.xlu1 %592 }
 0x74b   :  { %v601_v63 = vperm.slane %v593_v62, %v1090_v60  ;;  %v600_v57 = vperm.slane %v590_v53, %v1090_v60 }
 0x74d   :  { %v603_v2 = vsel %vm204_vm1, %v601_v63, %v600_v57 }
 0x752   :  { %v568_v58 = vpop.xlane.xlu2 %567  ;;  %v676_v8 = vpop.xlane.xlu1 %675 }
 0x753   :  { %v574_v59 = vperm.slane %v568_v58, %v1090_v60  ;;  %v686_v10 = vperm.slane %v676_v8, %v1090_v60 }
 0x755   :  { %v576_v19 = vsel %vm206_vm2, %v574_v59, %v575_v61 }
 0x756   :  { %v578_v38 = vsel %vm209_vm3, %v576_v19, 0.0 }
 0x757   :  { %579 = vadd.xlane.f32.xlu1 %v578_v38 }
 0x75a   :  { %v679_v3 = vpop.xlane.xlu2 %678 }
 0x75b   :  { %v687_v9 = vperm.slane %v679_v3, %v1090_v60 }
 0x75c   :  { %v596_v0 = vpop.xlane.xlu0 %595 }
 0x75d   :  { %v602_v1 = vperm.slane %v596_v0, %v1090_v60  ;;  %v689_v13 = vsel %vm204_vm1, %v687_v9, %v686_v10 }
 0x75f   :  { %v604_v5 = vsel %vm206_vm2, %v602_v1, %v603_v2 }
 0x760   :  { %v606_v6 = vsel %vm209_vm3, %v604_v5, 0.0 }
 0x761   :  { %607 = vadd.xlane.f32.xlu2 %v606_v6 }
 0x764   :  { %v682_v11 = vpop.xlane.xlu0 %681 }
 0x765   :  { %v688_v12 = vperm.slane %v682_v11, %v1090_v60 }
 0x767   :  { %v690_v14 = vsel %vm206_vm2, %v688_v12, %v689_v13 }
 0x768   :  { %v692_v15 = vsel %vm209_vm3, %v690_v14, 0.0 }
 0x769   :  { %693 = vadd.xlane.f32.xlu0 %v692_v15 }
 0x796   :  { %v772_v17 = vpop.xlane.xlu1 %771 }
 0x797   :  { %v782_v24 = vperm.slane %v772_v17, %v1090_v60 }
 0x79e   :  { %v775_v16 = vpop.xlane.xlu2 %774  ;;  %v413_v27 = vpop.xlane.xlu1 %412 }
 0x79f   :  { %v783_v23 = vperm.slane %v775_v16, %v1090_v60  ;;  %v423_v29 = vperm.slane %v413_v27, %v1090_v60 }
 0x7a1   :  { %v785_v37 = vsel %vm204_vm1, %v783_v23, %v782_v24 }
 0x7a6   :  { %v778_v25 = vpop.xlane.xlu0 %777  ;;  %v416_v18 = vpop.xlane.xlu2 %415 }
 0x7a7   :  { %v784_v26 = vperm.slane %v778_v25, %v1090_v60  ;;  %v424_v28 = vperm.slane %v416_v18, %v1090_v60 }
 0x7a9   :  { %v786_v20 = vsel %vm206_vm2, %v784_v26, %v785_v37  ;;  %v426_v32 = vsel %vm204_vm1, %v424_v28, %v423_v29 }
 0x7aa   :  { %v788_v21 = vsel %vm209_vm3, %v786_v20, 0.0 }
 0x7ab   :  { %789 = vadd.xlane.f32.xlu1 %v788_v21 }
 0x7ae   :  { %v419_v30 = vpop.xlane.xlu0 %418 }
 0x7af   :  { %v425_v31 = vperm.slane %v419_v30, %v1090_v60 }
 0x7b1   :  { %v427_v7 = vsel %vm206_vm2, %v425_v31, %v426_v32 }
 0x7b2   :  { %v429_v4 = vsel %vm209_vm3, %v427_v7, 0.0 }
 0x7b3   :  { %430 = vadd.xlane.f32.xlu2 %v429_v4 }
 0x7ca   :  { %v580_v34 = vpop.xlane.xlu1 %579 }
 0x7d4   :  { %v608_v35 = vpop.xlane.xlu2 %607 }
 0x7d5   :  { %v791_v39 = vsel %vm432_vm4, %v580_v34, %v608_v35 }
 0x7dc   :  { %v694_v36 = vpop.xlane.xlu0 %693 }
 0x7dd   :  { %v792_v41 = vsel %vm434_vm6, %v791_v39, %v694_v36 }
 0x81e   :  { %v790_v42 = vpop.xlane.xlu1 %789 }
 0x81f   :  { %v793_v43 = vsel %vm436_vm9, %v792_v41, %v790_v42 }
 0x820   :  { %v794_v60 = vadd.f32 %v793_v43, %v71_v40 }
 0x822   :  { %v795_v33 = vsel %vm439_vm10, %v794_v60, -inf }
 0x823   :  { %v796_v22 = vrot.slane %v795_v33, 4 }
 0x825   :  { %v797_v44 = vmax.f32 %v795_v33, %v796_v22 }
 0x826   :  { %v431_v45 = vpop.xlane.xlu2 %430 }
 0x827   :  { %v798_v46 = vrot.slane %v797_v44, 2  ;;  %v437_v47 = vsel %vm436_vm9, %v1190_v51, %v431_v45 }
 0x828   :  { %v438_v48 = vadd.f32 %v437_v47, %v71_v40 }
 0x829   :  { %v799_v49 = vmax.f32 %v797_v44, %v798_v46 }
 0x82a   :  { %v440_v50 = vsel %vm439_vm10, %v438_v48, -inf }
 0x82b   :  { %v800_v52 = vrot.slane %v799_v49, 1  ;;  %v441_v53 = vrot.slane %v440_v50, 4 }
 0x82d   :  { %v801_v54 = vmax.f32 %v799_v49, %v800_v52  ;;  %v442_v55 = vmax.f32 %v440_v50, %v441_v53 }
 0x82f   :  { %v802_v56 = vsub.f32 %v794_v60, %v801_v54  ;;  %v443_v58 = vrot.slane %v442_v55, 2 }
 0x831   :  { %v803_v59 = vmul.f32 1.442695, %v802_v56  ;;  %v444_v61 = vmax.f32 %v442_v55, %v443_v58 }
 0x833   :  { %882 = vpow2.f32 %v803_v59  ;;  %v445_v19 = vrot.slane %v444_v61, 1 }
 0x835   :  { %v446_v38 = vmax.f32 %v444_v61, %v445_v19 }
 0x837   :  { %v447_v62 = vsub.f32 %v438_v48, %v446_v38 }
 0x839   :  { %v883_v63 = vpop.eup %882  ;;  %v448_v57 = vmul.f32 1.442695, %v447_v62 }
 0x83a   :  { %v805_v51 = vsel %vm439_vm10, %v883_v63, 0.0 }
 0x83b   :  { %v806_v0 = vrot.slane %v805_v51, 4  ;;  %884 = vpow2.f32 %v448_v57 }
 0x83d   :  { %v807_v1 = vadd.f32 %v806_v0, %v805_v51 }
 0x83f   :  { %v808_v2 = vrot.slane %v807_v1, 2 }
 0x841   :  { %v885_v3 = vpop.eup %884  ;;  %v809_v5 = vadd.f32 %v808_v2, %v807_v1 }
 0x842   :  { %v450_v6 = vsel %vm439_vm10, %v885_v3, 0.0 }
 0x843   :  { %v810_v8 = vrot.slane %v809_v5, 1  ;;  %v451_v9 = vrot.slane %v450_v6, 4 }
 0x845   :  { %v811_v10 = vadd.f32 %v810_v8, %v809_v5  ;;  %v452_v11 = vadd.f32 %v451_v9, %v450_v6 }
 0x847   :  { %886 = vlog2.f32 %v811_v10  ;;  %v453_v12 = vrot.slane %v452_v11, 2 }
 0x849   :  { %v454_v13 = vadd.f32 %v453_v12, %v452_v11 }
 0x84b   :  { %v455_v14 = vrot.slane %v454_v13, 1 }
 0x84d   :  { %v887_v15 = vpop.eup %886  ;;  %v456_v16 = vadd.f32 %v455_v14, %v454_v13 }
 0x84e   :  { %v813_v17 = vmul.f32 0.6931472, %v887_v15 }
 0x84f   :  { %888 = vlog2.f32 %v456_v16 }
 0x850   :  { %v814_v23 = vadd.f32 %v813_v17, %v801_v54 }
 0x852   :  { %v815_v25 = vsub.f32 %v794_v60, %v814_v23 }
 0x854   :  { %v817_v18 = vrot.slane %v815_v25, 5 }
 0x855   :  { %v889_v24 = vpop.eup %888 }
 0x856   :  { %v458_v26 = vmul.f32 0.6931472, %v889_v24 }
 0x858   :  { %v459_v37 = vadd.f32 %v458_v26, %v446_v38 }
 0x85a   :  { %v460_v20 = vsub.f32 %v438_v48, %v459_v37 }
 0x85c   :  { %v820_v21 = vsel %vm819_vm11, %v460_v20, %v817_v18 }
 0x85d   :  { %822 = vst.msk [vmem:[%s1236_s3] sm:$0x3f] %vm821_vm12, %v820_v21 }
 0x85e   :  { %827 = vsyncpa [#allocation3], 1 }
 0x85f   :  { %828 = vsyncpa [#allocation5], 1 }

</bundles_post_ra>
